<compile_context>
chip_gen: v7x
topology: tpu7x:2x2x1
jax: 0.10.0
libtpu: 0.0.40
codegen_flags: <defaults>
</compile_context>

<pallas_src>
import jax
import jax.numpy as jnp
from jax.experimental import pallas as pl
from jax.experimental.pallas import tpu as pltpu


def _round_up(x: int, m: int) -> int:
    return ((x + m - 1) // m) * m


def _largest_divisor_tile(dim: int, unit: int, cap: int) -> int:
    """Largest multiple of `unit` that divides `dim` and is <= cap.

    `dim` is assumed to already be a multiple of `unit`, so `unit` is always a
    valid fallback.  Small trace-time loop (<= cap/unit iterations).
    """
    best = unit
    t = unit
    limit = min(cap, dim)
    while t <= limit:
        if dim % t == 0:
            best = t
        t += unit
    return best


# ---------------------------------------------------------------------------
# Kernels
# ---------------------------------------------------------------------------
def _linear_kernel_acc_out(x_ref, w_ref, o_ref):
    """f32 output: accumulate directly into the resident output block."""
    @pl.when(pl.program_id(2) == 0)
    def _init():
        o_ref[...] = jnp.zeros_like(o_ref)

    x_blk = x_ref[...]
    w_blk = w_ref[...]
    if x_blk.dtype != w_blk.dtype:          # static (trace-time) dtype check
        x_blk = x_blk.astype(w_blk.dtype)   # e.g. f32 x -> bf16 for bf16 weights
    o_ref[...] += jnp.dot(x_blk, w_blk, preferred_element_type=jnp.float32)


def _linear_kernel_scratch(x_ref, w_ref, o_ref, acc_ref):
    """Narrow output dtypes: f32 VMEM accumulator + cast/store on last K step."""
    @pl.when(pl.program_id(2) == 0)
    def _init():
        acc_ref[...] = jnp.zeros_like(acc_ref)

    x_blk = x_ref[...]
    w_blk = w_ref[...]
    if x_blk.dtype != w_blk.dtype:
        x_blk = x_blk.astype(w_blk.dtype)
    acc_ref[...] += jnp.dot(x_blk, w_blk, preferred_element_type=jnp.float32)

    @pl.when(pl.program_id(2) == pl.num_programs(2) - 1)
    def _store():
        o_ref[...] = acc_ref[...].astype(o_ref.dtype)


# ---------------------------------------------------------------------------
# Parameter preparation (one-time, NOT on the per-forward path)
# ---------------------------------------------------------------------------
def prepare_linear_params(weight, *, param_dtype=None):
    """Pad / (optionally) cast / transpose the nn.Linear weight once.

    weight: (out_features, in_features) as stored by nn.Linear.
    Returns (w_kn, out_features) with w_kn of shape (K_pad, N_pad); the kernel
    then contracts x's last dim with w_kn's first dim (no per-tile transpose).
    Set param_dtype=jnp.bfloat16 to halve weight HBM traffic (f32 accumulation
    is kept inside the kernel).
    """
    n, k = weight.shape
    kp = _round_up(k, 128)
    npad = _round_up(n, 128)
    w = weight if param_dtype is None else weight.astype(param_dtype)
    w_kn = w.T  # (K, N) — done once here, free per forward call.
    if (kp, npad) != (k, n):
        w_kn = jnp.pad(w_kn, ((0, kp - k), (0, npad - n)))
    return w_kn, n


# ---------------------------------------------------------------------------
# Forward
# ---------------------------------------------------------------------------
def linear_forward(x, w_kn, out_features, *, tm_cap=512, tn_cap=512, tk_cap=1024):
    """y = x @ W.T using a pre-prepared weight from `prepare_linear_params`."""
    b, k = x.shape
    kp, npad = w_kn.shape
    assert kp == _round_up(k, 128), (x.shape, w_kn.shape)

    sublane = 16 if x.dtype == jnp.bfloat16 else 8   # bf16 packs 16 sublanes
    mp = _round_up(b, sublane)

    # Tiles are divisors of the (minimally) padded dims -> no extra zero work.
    tm = _largest_divisor_tile(mp, sublane, tm_cap)
    tn = _largest_divisor_tile(npad, 128, tn_cap)
    tk = _largest_divisor_tile(kp, 128, tk_cap)

    # v7x megacore: ensure >= 2 tiles on the parallel (i, j) axes so both
    # TensorCores get work; tn stays a lane-dense 128-multiple.
    if (mp // tm) * (npad // tn) < 2 and npad >= 256:
        tn2 = _largest_divisor_tile(npad, 128, npad // 2)
        if npad // tn2 >= 2:
            tn = tn2

    # Per-call padding only touches the activations.
    x_p = x
    if (mp, kp) != (b, k):
        x_p = jnp.pad(x, ((0, mp - b), (0, kp - k)))

    grid = (mp // tm, npad // tn, kp // tk)

    out_dtype = x.dtype
    use_scratch = out_dtype != jnp.float32
    kernel = _linear_kernel_scratch if use_scratch else _linear_kernel_acc_out
    scratch_shapes = [pltpu.VMEM((tm, tn), jnp.float32)] if use_scratch else []

    x_item = jnp.dtype(x_p.dtype).itemsize
    w_item = jnp.dtype(w_kn.dtype).itemsize
    o_item = jnp.dtype(out_dtype).itemsize

    # Double-buffered inputs + double-buffered output (+ acc scratch if used).
    vmem_need = (2 * (tm * tk * x_item + tk * tn * w_item)
                 + 2 * tm * tn * o_item
                 + (tm * tn * 4 if use_scratch else 0))
    vmem_limit = min(64 * 1024 * 1024,
                     max(32 * 1024 * 1024, (vmem_need * 3) // 2 + (2 << 20)))

    out = pl.pallas_call(
        kernel,
        out_shape=jax.ShapeDtypeStruct((mp, npad), out_dtype),
        grid=grid,
        in_specs=[
            pl.BlockSpec((tm, tk), lambda i, j, kk: (i, kk)),
            pl.BlockSpec((tk, tn), lambda i, j, kk: (kk, j)),
        ],
        out_specs=pl.BlockSpec((tm, tn), lambda i, j, kk: (i, j)),
        scratch_shapes=scratch_shapes,
        compiler_params=pltpu.CompilerParams(
            dimension_semantics=("parallel", "parallel", "arbitrary"),
            vmem_limit_bytes=int(vmem_limit),
        ),
        cost_estimate=pl.CostEstimate(
            flops=2 * mp * npad * kp,
            transcendentals=0,
            # Account for re-streaming: x once per N-tile, W once per M-tile.
            bytes_accessed=(x_item * mp * kp * (npad // tn)
                            + w_item * npad * kp * (mp // tm)
                            + o_item * mp * npad),
        ),
    )(x_p, w_kn)

    if (mp, npad) != (b, out_features):
        out = out[:b, :out_features]
    return out


def linear_pallas(x, weight, *, param_dtype=None):
    """Convenience one-shot path (prep + forward). For steady-state serving,
    call prepare_linear_params once and reuse its result with linear_forward."""
    w_kn, n = prepare_linear_params(weight, param_dtype=param_dtype)
    return linear_forward(x, w_kn, n)


if __name__ == "__main__":
    key = jax.random.PRNGKey(0)
    kx, kw, kx2, kw2 = jax.random.split(key, 4)

    # Small shapes consistent with the module's forward: y = x @ W.T (bias=False).
    batch, in_features, out_features = 8, 32, 16
    x = jax.random.normal(kx, (batch, in_features), dtype=jnp.float32)
    weight = jax.random.normal(kw, (out_features, in_features), dtype=jnp.float32)

    w_prep, n_out = prepare_linear_params(weight)          # one-time param prep
    y = jax.block_until_ready(linear_forward(x, w_prep, n_out))
    y_ref = x @ weight.T
    assert y.shape == (batch, out_features)
    assert jnp.allclose(y, y_ref, atol=1e-5, rtol=1e-5)

    # Non-tile-multiple, multi-tile shape: tiles now divide the padded dims
    # (K=640 -> tk=640, N=320 -> npad=384 split into lane-dense tn=128 blocks).
    x2 = jax.random.normal(kx2, (64, 640), dtype=jnp.float32)
    w2 = jax.random.normal(kw2, (320, 640), dtype=jnp.float32)
    y2 = jax.block_until_ready(linear_pallas(x2, w2))
    assert y2.shape == (64, 320)
    assert jnp.allclose(y2, x2 @ w2.T, atol=2e-3, rtol=2e-3)

    # bf16-weight path: weight cast once at param prep, f32 accumulation in-kernel.
    w2_bf16, n2 = prepare_linear_params(w2, param_dtype=jnp.bfloat16)
    y3 = jax.block_until_ready(linear_forward(x2, w2_bf16, n2))
    y3_ref = jnp.dot(x2.astype(jnp.bfloat16), w2.astype(jnp.bfloat16).T,
                     preferred_element_type=jnp.float32)
    assert y3.shape == (64, 320)
    assert jnp.allclose(y3, y3_ref, atol=5e-2, rtol=5e-2)

    print("KERNEL_OK")
</pallas_src>

<mosaic_0001>
module attributes {stable_mosaic.version = 11 : i64} {
  func.func @_linear_kernel_acc_out(%arg0: i32, %arg1: i32, %arg2: i32, %arg3: memref<8x128xf32, #tpu.memory_space<vmem>>, %arg4: memref<128x128xf32, #tpu.memory_space<vmem>>, %arg5: memref<8x128xf32, #tpu.memory_space<vmem>>) attributes {dimension_semantics = [#tpu.dimension_semantics<parallel>, #tpu.dimension_semantics<parallel>, #tpu.dimension_semantics<arbitrary>], iteration_bounds = array<i64: 1, 1, 1>, scalar_prefetch = 0 : i64, scratch_operands = 0 : i64, tpu.core_type = #tpu.core_type<tc>, window_params = [{transform_indices = @transform_0, window_bounds = array<i64: 8, 128>}, {transform_indices = @transform_1, window_bounds = array<i64: 128, 128>}, {transform_indices = @transform_2, window_bounds = array<i64: 8, 128>}]} {
    %c0_i32 = arith.constant 0 : i32
    %0 = arith.cmpi eq, %arg2, %c0_i32 : i32
    %1 = arith.extui %0 : i1 to i32
    %c0_i32_0 = arith.constant 0 : i32
    %2 = arith.cmpi ne, %1, %c0_i32_0 : i32
    scf.if %2 {
      %cst_8 = arith.constant 0.000000e+00 : f32
      %9 = vector.broadcast %cst_8 : f32 to vector<8x128xf32>
      %c0_9 = arith.constant 0 : index
      %c0_10 = arith.constant 0 : index
      %10 = vector.load %arg5[%c0_9, %c0_10] : memref<8x128xf32, #tpu.memory_space<vmem>>, vector<8x128xf32>
      tpu.vector_store %arg5[%c0_9, %c0_10], %9 {strides = array<i32>} : memref<8x128xf32, #tpu.memory_space<vmem>>, vector<8x128xf32>,
    } else {
    }
    %c0 = arith.constant 0 : index
    %c0_1 = arith.constant 0 : index
    %3 = vector.load %arg3[%c0, %c0_1] : memref<8x128xf32, #tpu.memory_space<vmem>>, vector<8x128xf32>
    %c0_2 = arith.constant 0 : index
    %c0_3 = arith.constant 0 : index
    %4 = vector.load %arg4[%c0_2, %c0_3] : memref<128x128xf32, #tpu.memory_space<vmem>>, vector<128x128xf32>
    %c0_4 = arith.constant 0 : index
    %c0_5 = arith.constant 0 : index
    %5 = vector.load %arg5[%c0_4, %c0_5] : memref<8x128xf32, #tpu.memory_space<vmem>>, vector<8x128xf32>
    %cst = arith.constant dense<0.000000e+00> : vector<8x128xf32>
    %6 = tpu.matmul %3, %4, %cst {dimension_numbers = #tpu.dot_dimension_numbers<[1], [0], [0], [1], [0, 0, 1, 1], [], []>} : vector<8x128xf32>, vector<128x128xf32>, vector<8x128xf32> -> vector<8x128xf32>
    %7 = arith.addf %5, %6 : vector<8x128xf32>
    %c0_6 = arith.constant 0 : index
    %c0_7 = arith.constant 0 : index
    %8 = vector.load %arg5[%c0_6, %c0_7] : memref<8x128xf32, #tpu.memory_space<vmem>>, vector<8x128xf32>
    tpu.vector_store %arg5[%c0_6, %c0_7], %7 {strides = array<i32>} : memref<8x128xf32, #tpu.memory_space<vmem>>, vector<8x128xf32>,
    return
  }
  func.func @transform_0(%arg0: i32, %arg1: i32, %arg2: i32) -> (i32, i32) {
    %c0_i32 = arith.constant 0 : i32
    return %arg0, %arg2 : i32, i32
  }
  func.func @transform_1(%arg0: i32, %arg1: i32, %arg2: i32) -> (i32, i32) {
    %c0_i32 = arith.constant 0 : i32
    return %arg2, %arg1 : i32, i32
  }
  func.func @transform_2(%arg0: i32, %arg1: i32, %arg2: i32) -> (i32, i32) {
    %c0_i32 = arith.constant 0 : i32
    return %arg0, %arg1 : i32, i32
  }
}

</mosaic_0001>

<bundles_post_ra>
// kernel: tpu_custom_call.1
= control target key start
LH: loop header
LB: loop body
LE: loop exit
PB: predicated region body
PF: predicated region fallthrough
CT: control target
= control target key end

     0   :  { %7 = vsyncpa [#allocation3], 0  ;;  %s371_s0 = inlined_call_operand.hbm [shape: f32[8,128], index: 0, kind: input, shape index: {}]   ;;  %s372_s1 = inlined_call_operand.hbm [shape: f32[128,128], index: 1, kind: input, shape index: {}]   ;;  %s373_s2 = inlined_call_operand.hbm [shape: f32[8,128], index: 2, kind: output, shape index: {}]  }
   0x1   :  { %8 = vsyncpa [#allocation6], 0 }
   0x2   :  { %9 = vsyncpa [#allocation4], 0  ;;  %s305_s9 = smov [#allocation2]   ;;  %s306_s11 = smov [#allocation5]  }
   0x3   :  { %s16_s10 = sshll.u32 %s305_s9, 4  ;;  %s25_s12 = sshll.u32 %s306_s11, 4  ;;  %s17_s10 = int_to_ptr.vmem [resolvable:$true] %s16_s10  ;;  %s328_s12 = int_to_ptr.vmem [resolvable:$true] %s25_s12 }
   0x4   :  { %s233_s15 = scalar_lea.hbm %s371_s0, 128 }
   0x5   :  { %p234_p0 = scmp.ne.s32.totalorder %s371_s0, %s233_s15  ;;  %p237_p1 = scmp.lt.u32.totalorder %s233_s15, %s371_s0 }
   0x7   :  { %p239_p2 = pnand %p237_p1, %p234_p0 }
   0x9   :  { %242 = shalt.err (!%p239_p2)
}
   0xa   :  { %s243_s20 = scalar_lea.vmem %s17_s10, 128  ;;  %p248_p4 = scmp.lt.s32.totalorder %s17_s10, %s17_s10 }
   0xb   :  { %p244_p3 = scmp.ne.s32.totalorder %s17_s10, %s243_s20  ;;  %p249_p5 = scmp.lt.s32.totalorder %s243_s20, %s243_s20 }
   0xd   :  { %p250_p6 = por %p249_p5, %p248_p4 }
   0xf   :  { %p251_p7 = pnand %p250_p6, %p244_p3 }
  0x11   :  { %254 = shalt.err (!%p251_p7)
}
  0x12   :  { %19 = dma.hbm_to_vmem [thread:$0]  %s371_s0, 128, %s17_s10, [#allocation3]  }
  0x13   :  { %s255_s25 = scalar_lea.hbm %s372_s1, 2048 }
  0x14   :  { %p256_p8 = scmp.ne.s32.totalorder %s372_s1, %s255_s25  ;;  %p259_p9 = scmp.lt.u32.totalorder %s255_s25, %s372_s1 }
  0x16   :  { %p261_p10 = pnand %p259_p9, %p256_p8 }
  0x18   :  { %264 = shalt.err (!%p261_p10)
}
  0x19   :  { %s265_s30 = scalar_lea.vmem %s328_s12, 2048  ;;  %p270_p12 = scmp.lt.s32.totalorder %s328_s12, %s328_s12 }
  0x1a   :  { %p266_p11 = scmp.ne.s32.totalorder %s328_s12, %s265_s30  ;;  %p271_p13 = scmp.lt.s32.totalorder %s265_s30, %s265_s30 }
  0x1c   :  { %p272_p0 = por %p271_p13, %p270_p12 }
  0x1e   :  { %p273_p1 = pnand %p272_p0, %p266_p11 }
  0x20   :  { %276 = shalt.err (!%p273_p1)
}
  0x21   :  { %s307_s0 = smov 128   ;;  %s308_s3 = smov 8  }
  0x22   :  { %31 = dma.hbm_to_vmem [thread:$0]  %s372_s1, 2048, %s328_s12, [#allocation6], %s307_s0, %s307_s0, %s308_s3  }
  0x23   :  { %299 = dma.done.wait [#allocation3], 128  }
  0x24   :  { %300 = vsyncadd [#allocation3], 4294967168 }
  0x25   :  { %301 = dma.done.wait [#allocation6], 2048  }
  0x26   :  { %302 = vsyncadd [#allocation6], 4294965248  ;;  %v309_v0 = vmov 0.0|0.0   ;;  %vm310_vm0 = vmmov 0   ;;  %v311_v1 = vmov 0.0   ;;  %v44_v2 = vld [vmem:[#allocation5] sm:$0xff] }
  0x27   :  { %201 = vmatprep.subr.bf16.mxu0 %v309_v0  ;;  %198 = vmatprep.mubr.msk.f32.mxu0 %vm310_vm0, %v311_v1  ;;  %v45_v3 = vld [vmem:[#allocation5 + $0x8] sm:$0xff]  ;;  %v46_v4 = vld [vmem:[#allocation5 + $0x10] sm:$0xff]  ;;  %v47_v6 = vld [vmem:[#allocation5 + $0x18] sm:$0xff]  ;;  %s312_s1 = smov [#allocation7]  }
  0x28   :  { %v202_v5 = vpack.c.bf16 %v45_v3, %v44_v2  ;;  %v205_v7 = vpack.c.bf16 %v47_v6, %v46_v4  ;;  %v48_v8 = vld [vmem:[#allocation5 + $0x20] sm:$0xff]  ;;  %v49_v9 = vld [vmem:[#allocation5 + $0x28] sm:$0xff]  ;;  %v50_v11 = vld [vmem:[#allocation5 + $0x30] sm:$0xff]  ;;  %s139_s6 = sshll.u32 %s312_s1, 4  ;;  %s140_s6 = int_to_ptr.vmem [resolvable:$true] %s139_s6 }
  0x29   :  { %v208_v10 = vpack.c.bf16 %v49_v9, %v48_v8  ;;  %v51_v12 = vld [vmem:[#allocation5 + $0x38] sm:$0xff]  ;;  %v52_v14 = vld [vmem:[#allocation5 + $0x40] sm:$0xff]  ;;  %v53_v15 = vld [vmem:[#allocation5 + $0x48] sm:$0xff]  ;;  %s277_s7 = scalar_lea.vmem %s140_s6, 128  ;;  %p282_p3 = scmp.lt.s32.totalorder %s140_s6, %s140_s6 }
  0x2a   :  { %203 = vmatpush3.bf16.msra.mxu0 %v202_v5  ;;  %v211_v13 = vpack.c.bf16 %v51_v12, %v50_v11  ;;  %v214_v16 = vpack.c.bf16 %v53_v15, %v52_v14  ;;  %v54_v17 = vld [vmem:[#allocation5 + $0x50] sm:$0xff]  ;;  %v55_v18 = vld [vmem:[#allocation5 + $0x58] sm:$0xff]  ;;  %v56_v20 = vld [vmem:[#allocation5 + $0x60] sm:$0xff]  ;;  %p278_p2 = scmp.ne.s32.totalorder %s140_s6, %s277_s7  ;;  %p283_p4 = scmp.lt.s32.totalorder %s277_s7, %s277_s7 }
  0x2b   :  { %204 = vmatprep.subr.bf16.mxu0 %v309_v0  ;;  %v217_v19 = vpack.c.bf16 %v55_v18, %v54_v17  ;;  %v57_v21 = vld [vmem:[#allocation5 + $0x68] sm:$0xff]  ;;  %v58_v23 = vld [vmem:[#allocation5 + $0x70] sm:$0xff]  ;;  %v59_v24 = vld [vmem:[#allocation5 + $0x78] sm:$0xff] }
  0x2c   :  { %v220_v22 = vpack.c.bf16 %v57_v21, %v56_v20  ;;  %v223_v25 = vpack.c.bf16 %v59_v24, %v58_v23  ;;  %v43_v26 = vld [vmem:[#allocation2] sm:$0xff]  ;;  %p284_p5 = por %p283_p4, %p282_p3 }
  0x2e   :  { %206 = vmatpush3.bf16.msra.mxu0 %v205_v7  ;;  %p285_p6 = pnand %p284_p5, %p278_p2 }
  0x2f   :  { %207 = vmatprep.subr.bf16.mxu0 %v309_v0 }
  0x32   :  { %209 = vmatpush3.bf16.msra.mxu0 %v208_v10 }
  0x33   :  { %210 = vmatprep.subr.bf16.mxu0 %v309_v0 }
  0x36   :  { %212 = vmatpush3.bf16.msra.mxu0 %v211_v13 }
  0x37   :  { %213 = vmatprep.subr.bf16.mxu0 %v309_v0 }
  0x3a   :  { %215 = vmatpush3.bf16.msra.mxu0 %v214_v16 }
  0x3b   :  { %216 = vmatprep.subr.bf16.mxu0 %v309_v0 }
  0x3e   :  { %218 = vmatpush3.bf16.msra.mxu0 %v217_v19 }
  0x3f   :  { %219 = vmatprep.subr.bf16.mxu0 %v309_v0 }
  0x42   :  { %221 = vmatpush3.bf16.msra.mxu0 %v220_v22 }
  0x43   :  { %222 = vmatprep.subr.bf16.mxu0 %v309_v0 }
  0x46   :  { %224 = vmatpush3.bf16.msra.mxu0 %v223_v25 }
  0x49   :  { %199 = vmatmul.mubr.f32.vlgmr.msra.gmra.mrb[0].mxu0 %v43_v26 }
 0x11c   :  { %v127_v27 = vpop.f32.mrb[0].mxu0 }
 0x11d   :  { %v200_v28 = vpop.f32.mrb[1].mxu0  ;;  %132 = vst [vmem:[#allocation7] sm:$0xff] %v127_v27 }
 0x11e   :  { %288 = shalt.err (!%p285_p6)
}
 0x11f   :  { %s289_s10 = scalar_lea.hbm %s373_s2, 128 }
 0x120   :  { %p290_p7 = scmp.ne.s32.totalorder %s373_s2, %s289_s10  ;;  %p293_p8 = scmp.lt.u32.totalorder %s289_s10, %s373_s2 }
 0x122   :  { %p295_p9 = pnand %p293_p8, %p290_p7 }
 0x124   :  { %298 = shalt.err (!%p295_p9)
}
 0x125   :  { %142 = dma.vmem_to_hbm [thread:$0]  %s140_s6, 128, %s373_s2, [#allocation4]  }
 0x126   :  { %303 = dma.done.wait [#allocation4], 128  }
 0x127   :  { %304 = vsyncadd [#allocation4], 4294967168 }
 0x128   :  { %146 = vsyncpa [#allocation3], 1 }
 0x129   :  { %147 = vsyncpa [#allocation6], 1 }
 0x12a   :  { %148 = vsyncpa [#allocation4], 1 }

</bundles_post_ra>
